<compile_context>
chip_gen: v7x
topology: tpu7x:2x2x1
jax: 0.10.0
libtpu: 0.0.40
codegen_flags: <defaults>
</compile_context>

<pallas_src>
import math

import jax
import jax.numpy as jnp
from jax.experimental import pallas as pl
from jax.experimental.pallas import tpu as pltpu

_MiB = 1024 * 1024


def _clamp_kernel(bounds_ref, x_ref, o_ref):
    # bounds_ref: (2,) float32 in SMEM -> cast to the image dtype so integer /
    # low-precision images stay in their own dtype on the VPU.
    lo = bounds_ref[0].astype(o_ref.dtype)
    hi = bounds_ref[1].astype(o_ref.dtype)
    # maximum-then-minimum matches torch.clamp NaN propagation.
    o_ref[...] = jnp.minimum(jnp.maximum(x_ref[...], lo), hi)


def _vmem_capacity_bytes():
    """Physical VMEM of the current TPU generation (conservative fallback)."""
    try:
        info = pltpu.get_tpu_info()
        cap = getattr(info, "vmem_capacity_bytes", None)
        if cap:
            return int(cap)
    except Exception:
        pass
    return 64 * _MiB  # v7x has the smallest per-TC VMEM -> safe default


def _target_tile_bytes():
    # ~8 MiB tiles: with in+out double buffering that's ~32 MiB of VMEM,
    # comfortably under v7x's 64 MiB and tiny vs 128 MiB on v5e/v6e, while
    # amortizing the ~0.35 us per-grid-step cost to a few percent.
    vmem = _vmem_capacity_bytes()
    return int(min(8 * _MiB, max(2 * _MiB, vmem // 8)))


def _vmem_limit_bytes(tile_bytes):
    # ~4x tile (double-buffered in + out) plus headroom, capped well under
    # the physical VMEM of this generation (48 MiB on v7x, 48-96 MiB else).
    vmem = _vmem_capacity_bytes()
    return int(min(vmem * 3 // 4, max(32 * _MiB, 6 * tile_bytes)))


def _choose_lanes(n):
    """Widest multiple-of-128 lane width (<=1024) dividing n, else None."""
    for lanes in (1024, 512, 256, 128):
        if n % lanes == 0:
            return lanes
    return None


def _choose_tile_rows(rows, lanes, itemsize):
    """Block height: dtype-aware sublane multiple, ~8 MiB blocks, and >=4
    grid steps (>=2 per v7x TensorCore) whenever the array allows it."""
    sub = max(8, 32 // itemsize)  # packed sublane multiple: 8 f32, 16 bf16, 32 int8
    if rows <= sub:
        # Tiny input: one full-height block (block dim == full array dim
        # waives the sublane divisibility requirement).
        return rows
    cap = (_target_tile_bytes() // (lanes * itemsize)) // sub * sub
    cap = max(sub, cap)
    quarter = -(-rows // 4)            # ceil(rows / 4) -> aim for >= 4 steps
    quarter = -(-quarter // sub) * sub
    return max(sub, min(cap, quarter))


def _clamp_2d(x2d, bounds, tile_rows):
    rows, lanes = x2d.shape
    itemsize = jnp.dtype(x2d.dtype).itemsize
    tile_bytes = tile_rows * lanes * itemsize
    return pl.pallas_call(
        _clamp_kernel,
        out_shape=jax.ShapeDtypeStruct((rows, lanes), x2d.dtype),
        grid_spec=pltpu.PrefetchScalarGridSpec(
            num_scalar_prefetch=0,
            grid=(pl.cdiv(rows, tile_rows),),
            in_specs=[
                # (2,) clamp bounds, whole array resident in SMEM.
                pl.BlockSpec(memory_space=pltpu.MemorySpace.SMEM),
                pl.BlockSpec((tile_rows, lanes), lambda i: (i, 0)),
            ],
            out_specs=pl.BlockSpec((tile_rows, lanes), lambda i: (i, 0)),
        ),
        compiler_params=pltpu.CompilerParams(
            dimension_semantics=(pltpu.PARALLEL,),
            vmem_limit_bytes=_vmem_limit_bytes(tile_bytes),
        ),
        # The image is consumed by the clamp -> allow the output to reuse its
        # HBM buffer (XLA inserts a copy only if the input is still live).
        input_output_aliases={1: 0},
    )(bounds, x2d)


class MinMaxChopWithMask:
    """JAX/Pallas port of ds.datasets.db_improc.MinMaxChopWithMask."""

    def __init__(self, min_val: float = 0.0, max_val: float = 1.0):
        self.min_ = float(min_val)
        self.max_ = float(max_val)

    def _bounds_for(self, dtype):
        lo, hi = self.min_, self.max_
        if jnp.issubdtype(dtype, jnp.integer):
            # Integer clamp onto a real interval [lo, hi]: nearest integers
            # inside the interval are ceil(lo) / floor(hi).
            lo, hi = float(math.ceil(lo)), float(math.floor(hi))
        return lo, hi

    def __call__(self, image, target=None):
        lo, hi = self._bounds_for(image.dtype)
        n = image.size
        lanes = _choose_lanes(n)

        if lanes is None or n == 0:
            # Rare misaligned shape: a fused XLA clip is a single read+write
            # pass at HBM roofline (vs ~3x traffic for pad + kernel + slice).
            y = jnp.clip(image,
                         jnp.asarray(lo, image.dtype),
                         jnp.asarray(hi, image.dtype))
            return y, target

        rows = n // lanes
        itemsize = jnp.dtype(image.dtype).itemsize
        bounds = jnp.array([lo, hi], dtype=jnp.float32)

        x2d = image.reshape(rows, lanes)      # contiguous flatten: layout no-op
        tile_rows = _choose_tile_rows(rows, lanes, itemsize)
        y2d = _clamp_2d(x2d, bounds, tile_rows)

        # target (optional mask dict) passes through untouched, matching the
        # torch module's semantics.
        return y2d.reshape(image.shape), target


if __name__ == "__main__":
    key = jax.random.PRNGKey(0)
    k0, k1, k2 = jax.random.split(key, 3)

    chop = MinMaxChopWithMask(min_val=0.0, max_val=1.0)

    # NCHW f32 image with values outside [0, 1] so the clamp does real work.
    x = jax.random.normal(k0, (2, 4, 16, 16), dtype=jnp.float32) * 2.0
    target = {"mask": jnp.ones((2, 1, 16, 16), dtype=jnp.float32)}
    ref = jnp.clip(x, 0.0, 1.0)
    out, out_target = chop(x, target)
    out = jax.block_until_ready(out)
    assert out.shape == x.shape and out.dtype == x.dtype
    assert jnp.array_equal(out, ref)
    assert out_target is target

    # bf16 image large enough for a multi-step grid (exercises the dtype-aware
    # 16-sublane tile rounding).
    xb = (jax.random.normal(k1, (4, 8, 32, 32), dtype=jnp.float32) * 2.0
          ).astype(jnp.bfloat16)
    refb = jnp.clip(xb, 0.0, 1.0)
    outb, _ = chop(xb, None)
    outb = jax.block_until_ready(outb)
    assert outb.dtype == jnp.bfloat16 and outb.shape == xb.shape
    assert jnp.array_equal(outb, refb)

    # Element count not a multiple of 128 -> fused XLA clip fallback path.
    x_odd = jax.random.normal(k2, (3, 5, 7), dtype=jnp.float32) * 3.0
    out_odd, _ = chop(x_odd, None)
    out_odd = jax.block_until_ready(out_odd)
    assert jnp.array_equal(out_odd, jnp.clip(x_odd, 0.0, 1.0))

    print("KERNEL_OK")
</pallas_src>

<mosaic_0001>
module attributes {stable_mosaic.version = 11 : i64} {
  func.func @_clamp_kernel(%arg0: i32, %arg1: memref<2xf32, #tpu.memory_space<smem>>, %arg2: memref<2x1024xf32, #tpu.memory_space<vmem>>, %arg3: memref<2x1024xf32, #tpu.memory_space<vmem>>) attributes {dimension_semantics = [#tpu.dimension_semantics<parallel>], iteration_bounds = array<i64: 1>, scalar_prefetch = 0 : i64, scratch_operands = 0 : i64, tpu.core_type = #tpu.core_type<tc>, window_params = [{transform_indices = @transform_0, window_bounds = array<i64: 2>}, {transform_indices = @transform_1, window_bounds = array<i64: 2, 1024>}, {transform_indices = @transform_2, window_bounds = array<i64: 2, 1024>}]} {
    %c0 = arith.constant 0 : index
    %0 = memref.load %arg1[%c0] : memref<2xf32, #tpu.memory_space<smem>>
    %c1 = arith.constant 1 : index
    %1 = memref.load %arg1[%c1] : memref<2xf32, #tpu.memory_space<smem>>
    %c0_0 = arith.constant 0 : index
    %c0_1 = arith.constant 0 : index
    %2 = vector.load %arg2[%c0_0, %c0_1] : memref<2x1024xf32, #tpu.memory_space<vmem>>, vector<2x1024xf32>
    %3 = vector.broadcast %0 : f32 to vector<2x1024xf32>
    %4 = arith.maximumf %2, %3 : vector<2x1024xf32>
    %5 = vector.broadcast %1 : f32 to vector<2x1024xf32>
    %6 = arith.minimumf %4, %5 : vector<2x1024xf32>
    %c0_2 = arith.constant 0 : index
    %c0_3 = arith.constant 0 : index
    %7 = vector.load %arg3[%c0_2, %c0_3] : memref<2x1024xf32, #tpu.memory_space<vmem>>, vector<2x1024xf32>
    tpu.vector_store %arg3[%c0_2, %c0_3], %6 {strides = array<i32>} : memref<2x1024xf32, #tpu.memory_space<vmem>>, vector<2x1024xf32>,
    return
  }
  func.func @transform_0(%arg0: i32) -> i32 {
    %c0_i32 = arith.constant 0 : i32
    %c0_i32_0 = arith.constant 0 : i32
    return %c0_i32 : i32
  }
  func.func @transform_1(%arg0: i32) -> (i32, i32) {
    %c0_i32 = arith.constant 0 : i32
    %c0_i32_0 = arith.constant 0 : i32
    return %arg0, %c0_i32 : i32, i32
  }
  func.func @transform_2(%arg0: i32) -> (i32, i32) {
    %c0_i32 = arith.constant 0 : i32
    %c0_i32_0 = arith.constant 0 : i32
    return %arg0, %c0_i32 : i32, i32
  }
}

</mosaic_0001>

<bundles_post_ra>
// kernel: tpu_custom_call.1
= control target key start
LH: loop header
LB: loop body
LE: loop exit
PB: predicated region body
PF: predicated region fallthrough
CT: control target
= control target key end

     0   :  { %7 = vsyncpa [#allocation5], 0  ;;  %s176_s0 = inlined_call_operand.vmem [shape: f32[2], index: 0, kind: input, shape index: {}]   ;;  %s177_s1 = inlined_call_operand.hbm [shape: f32[2,1024], index: 1, kind: input, shape index: {}, may-alias: {1,2}]   ;;  %s178_s2 = inlined_call_operand.hbm [shape: f32[2,1024], index: 2, kind: output, shape index: {}, may-alias: {1,2}]  }
   0x1   :  { %8 = vsyncpa [#allocation3], 0 }
   0x2   :  { %9 = vsyncpa [#allocation4], 0  ;;  %s16_s11 = sshll.u32 %s176_s0, 4  ;;  %s17_s11 = int_to_ptr.vmem [resolvable:$true] %s16_s11 }
   0x3   :  { %s69_s12 = scalar_lea.vmem %s17_s11, 16  ;;  %p74_p1 = scmp.lt.s32.totalorder %s17_s11, %s17_s11 }
   0x4   :  { %p70_p0 = scmp.ne.s32.totalorder %s17_s11, %s69_s12  ;;  %p75_p2 = scmp.lt.s32.totalorder %s69_s12, %s69_s12 }
   0x6   :  { %p76_p3 = por %p75_p2, %p74_p1 }
   0x8   :  { %p77_p4 = pnand %p76_p3, %p70_p0 }
   0xa   :  { %80 = shalt.err (!%p77_p4)
}
   0xb   :  { %s131_s13 = smov [#allocation2]   ;;  %s132_s14 = smov [#allocation6]  }
   0xc   :  { %19 = dma.vmem_to_smem %s17_s11, 16, %s131_s13, [#allocation5]  }
   0xd   :  { %s26_s15 = sshll.u32 %s132_s14, 4  ;;  %s81_s18 = scalar_lea.hbm %s177_s1, 256  ;;  %s27_s15 = int_to_ptr.vmem [resolvable:$true] %s26_s15 }
   0xe   :  { %p82_p5 = scmp.ne.s32.totalorder %s177_s1, %s81_s18  ;;  %p85_p6 = scmp.lt.u32.totalorder %s81_s18, %s177_s1 }
  0x10   :  { %p87_p7 = pnand %p85_p6, %p82_p5 }
  0x12   :  { %90 = shalt.err (!%p87_p7)
}
  0x13   :  { %s91_s22 = scalar_lea.vmem %s27_s15, 256  ;;  %p96_p9 = scmp.lt.s32.totalorder %s27_s15, %s27_s15 }
  0x14   :  { %p92_p8 = scmp.ne.s32.totalorder %s27_s15, %s91_s22  ;;  %p97_p10 = scmp.lt.s32.totalorder %s91_s22, %s91_s22 }
  0x16   :  { %p98_p11 = por %p97_p10, %p96_p9 }
  0x18   :  { %p99_p12 = pnand %p98_p11, %p92_p8 }
  0x1a   :  { %102 = shalt.err (!%p99_p12)
}
  0x1b   :  { %29 = dma.hbm_to_vmem [thread:$0]  %s177_s1, 256, %s27_s15, [#allocation3]  }
  0x1c   :  { %125 = dma.done.wait [#allocation5], 16  }
  0x1d   :  { %126 = vsyncadd [#allocation5], 4294967280 }
  0x1e   :  { %127 = dma.done.wait [#allocation3], 256  }
  0x1f   :  { %128 = vsyncadd [#allocation3], 4294967040 }
  0x20   :  { %36 = sfence }
  0x21   :  { %s37_s25 = sld [smem:[#allocation2]]  ;;  %s65_s26 = sld [smem:[#allocation2 + $0x1]]  ;;  %v39_v0 = vld [vmem:[#allocation6] sm:$0xff]  ;;  %v40_v1 = vld [vmem:[#allocation6 + $0x8] sm:$0xff] }
  0x22   :  { %s133_s27 = smov [#allocation7]  }
  0x23   :  { %s55_s28 = sshll.u32 %s133_s27, 4  ;;  %s56_s28 = int_to_ptr.vmem [resolvable:$true] %s55_s28 }
  0x24   :  { %s103_s1 = scalar_lea.vmem %s56_s28, 256  ;;  %p108_p0 = scmp.lt.s32.totalorder %s56_s28, %s56_s28 }
  0x25   :  { %p104_p13 = scmp.ne.s32.totalorder %s56_s28, %s103_s1  ;;  %p109_p1 = scmp.lt.s32.totalorder %s103_s1, %s103_s1 }
  0x27   :  { %v41_v2 = vstv %s37_s25  ;;  %v44_v3 = vstv %s65_s26  ;;  %p110_p2 = por %p109_p1, %p108_p0 }
  0x28   :  { %v42_v4 = vmax.f32 %v39_v0, %v41_v2  ;;  %v43_v5 = vmax.f32 %v40_v1, %v41_v2 }
  0x29   :  { %p111_p3 = pnand %p110_p2, %p104_p13 }
  0x2a   :  { %v45_v6 = vmin.f32 %v42_v4, %v44_v3  ;;  %v46_v7 = vmin.f32 %v43_v5, %v44_v3 }
  0x2c   :  { %47 = vst [vmem:[#allocation7] sm:$0xff] %v45_v6  ;;  %48 = vst [vmem:[#allocation7 + $0x8] sm:$0xff] %v46_v7 }
  0x2d   :  { %114 = shalt.err (!%p111_p3)
}
  0x2e   :  { %s115_s3 = scalar_lea.hbm %s178_s2, 256 }
  0x2f   :  { %p116_p4 = scmp.ne.s32.totalorder %s178_s2, %s115_s3  ;;  %p119_p5 = scmp.lt.u32.totalorder %s115_s3, %s178_s2 }
  0x31   :  { %p121_p6 = pnand %p119_p5, %p116_p4 }
  0x33   :  { %124 = shalt.err (!%p121_p6)
}
  0x34   :  { %58 = dma.vmem_to_hbm [thread:$0]  %s56_s28, 256, %s178_s2, [#allocation4]  }
  0x35   :  { %129 = dma.done.wait [#allocation4], 256  }
  0x36   :  { %130 = vsyncadd [#allocation4], 4294967040 }
  0x37   :  { %62 = vsyncpa [#allocation3], 1 }
  0x38   :  { %63 = vsyncpa [#allocation4], 1 }
  0x39   :  { %64 = vsyncpa [#allocation5], 1 }

</bundles_post_ra>
